<compile_context>
chip_gen: v6e
topology: v6e:2x2x1
jax: 0.10.0
libtpu: 0.0.40
codegen_flags: <defaults>
</compile_context>

<pallas_src>
import functools
import math

import jax
import jax.numpy as jnp
from jax.experimental import pallas as pl
from jax.experimental.pallas import tpu as pltpu

_LANES = 128
_SUBLANES = 8


def _focal_loss_kernel(x_ref, t_ref, o_ref, *, alpha, gamma, total_n,
                       tile_rows, tiles_per_core, needs_mask):
    p = pl.program_id(0)   # parallel (core) axis
    i = pl.program_id(1)   # reduction axis

    @pl.when(i == 0)
    def _():
        o_ref[...] = jnp.zeros_like(o_ref)

    x = x_ref[...].astype(jnp.float32)
    t = t_ref[...].astype(jnp.float32)

    # Numerically-stable BCE-with-logits (matches torch BCEWithLogits,
    # reduction='none', weight=None):
    #   bce = max(x, 0) - x*t + log1p(exp(-|x|))
    bce = jnp.maximum(x, 0.0) - x * t + jnp.log1p(jnp.exp(-jnp.abs(x)))
    pt = jnp.exp(-bce)
    one_minus_pt = 1.0 - pt

    g = float(gamma)
    if g == int(g) and 0 <= int(g) <= 4:
        # Small integer gamma: repeated multiply (VPU) instead of pow, which
        # would lower to exp(g*log(1-pt)) (2 extra EUP ops + NaN hazard).
        mod = jnp.ones_like(one_minus_pt)
        for _ in range(int(g)):
            mod = mod * one_minus_pt
    else:
        mod = jnp.maximum(one_minus_pt, 0.0) ** g

    f_loss = (alpha * mod) * bce

    if needs_mask:
        # Zero out the padded tail (global flat index >= total_n).
        row0 = (p * tiles_per_core + i) * tile_rows
        row_idx = row0 + jax.lax.broadcasted_iota(jnp.int32, f_loss.shape, 0)
        lane_idx = jax.lax.broadcasted_iota(jnp.int32, f_loss.shape, 1)
        gidx = row_idx * _LANES + lane_idx
        f_loss = jnp.where(gidx < total_n, f_loss, 0.0)

    # Reduce the tile down to one (8, 128) vreg of per-lane partial sums
    # (pure VPU adds); the single cross-lane/cross-sublane reduce + mean
    # happens once, outside the kernel.
    partial = f_loss.reshape(tile_rows // _SUBLANES, _SUBLANES, _LANES).sum(axis=0)
    o_ref[...] += partial[None]


def focal_loss(inputs, targets, alpha=1.0, gamma=2.0):
    """Focal loss, reduction='mean'. inputs/targets: same shape (e.g. NCHW)."""
    assert inputs.shape == targets.shape
    total_n = int(math.prod(inputs.shape))

    # (2048, 128) f32 tile = 1 MiB; x2 inputs x2 pipeline buffers = 4 MiB VMEM.
    target_tile_rows = 2048

    rows_needed = pl.cdiv(total_n, _LANES)
    tile_rows = min(target_tile_rows, pl.cdiv(rows_needed, _SUBLANES) * _SUBLANES)
    num_tiles = pl.cdiv(rows_needed, tile_rows)
    # Split the reduction across the 2 TensorCores on v7x; harmless (serial)
    # on single-TC v5e/v6e.
    num_parallel = 2 if num_tiles >= 2 else 1
    tiles_per_core = pl.cdiv(num_tiles, num_parallel)
    rows = num_parallel * tiles_per_core * tile_rows
    padded_n = rows * _LANES
    needs_mask = padded_n != total_n

    x = jnp.ravel(inputs)
    t = jnp.ravel(targets)
    if needs_mask:
        pad = padded_n - total_n
        x = jnp.pad(x, (0, pad))
        t = jnp.pad(t, (0, pad))
    x2 = x.reshape(rows, _LANES)
    t2 = t.reshape(rows, _LANES)

    kernel = functools.partial(
        _focal_loss_kernel,
        alpha=float(alpha),
        gamma=float(gamma),
        total_n=total_n,
        tile_rows=tile_rows,
        tiles_per_core=tiles_per_core,
        needs_mask=needs_mask,
    )

    in_spec = pl.BlockSpec(
        (tile_rows, _LANES), lambda p, i: (p * tiles_per_core + i, 0))

    partials = pl.pallas_call(
        kernel,
        out_shape=jax.ShapeDtypeStruct(
            (num_parallel, _SUBLANES, _LANES), jnp.float32),
        grid_spec=pltpu.PrefetchScalarGridSpec(
            num_scalar_prefetch=0,
            grid=(num_parallel, tiles_per_core),
            in_specs=[in_spec, in_spec],
            out_specs=pl.BlockSpec(
                (1, _SUBLANES, _LANES), lambda p, i: (p, 0, 0)),
        ),
        compiler_params=pltpu.CompilerParams(
            dimension_semantics=("parallel", "arbitrary"),
            vmem_limit_bytes=64 * 1024 * 1024,
        ),
    )(x2, t2)

    # Final cross-lane / cross-core reduce + 'mean' reduction, once, in XLA.
    return jnp.sum(partials) / total_n


if __name__ == "__main__":
    key = jax.random.PRNGKey(0)

    def ref_focal(x, t, alpha=1.0, gamma=2.0):
        bce = jnp.maximum(x, 0.0) - x * t + jnp.log1p(jnp.exp(-jnp.abs(x)))
        pt = jnp.exp(-bce)
        return jnp.mean(alpha * (1.0 - pt) ** gamma * bce)

    keys = jax.random.split(key, 6)

    # 1) NCHW, 128-divisible element count (single tile, no masking).
    x1 = jax.random.normal(keys[0], (2, 4, 16, 16), dtype=jnp.float32)
    t1 = (jax.random.uniform(keys[1], (2, 4, 16, 16)) > 0.5).astype(jnp.float32)
    loss1 = focal_loss(x1, t1, alpha=1.0, gamma=2.0)
    jax.block_until_ready(loss1)
    ref1 = ref_focal(x1, t1, alpha=1.0, gamma=2.0)
    assert jnp.allclose(loss1, ref1, rtol=1e-4, atol=1e-6), (loss1, ref1)

    # 2) Non-128-divisible shape exercises the padded/masked tail path.
    x2 = jax.random.normal(keys[2], (2, 3, 15, 17), dtype=jnp.float32)
    t2 = (jax.random.uniform(keys[3], (2, 3, 15, 17)) > 0.5).astype(jnp.float32)
    loss2 = focal_loss(x2, t2, alpha=0.25, gamma=2.0)
    jax.block_until_ready(loss2)
    ref2 = ref_focal(x2, t2, alpha=0.25, gamma=2.0)
    assert jnp.allclose(loss2, ref2, rtol=1e-4, atol=1e-6), (loss2, ref2)

    # 3) Larger input exercises multi-tile accumulation + the 2-core split.
    x3 = jax.random.normal(keys[4], (4, 16, 128, 128), dtype=jnp.float32)
    t3 = (jax.random.uniform(keys[5], (4, 16, 128, 128)) > 0.5).astype(jnp.float32)
    loss3 = focal_loss(x3, t3, alpha=1.0, gamma=2.0)
    jax.block_until_ready(loss3)
    ref3 = ref_focal(x3, t3, alpha=1.0, gamma=2.0)
    assert jnp.allclose(loss3, ref3, rtol=1e-4, atol=1e-6), (loss3, ref3)

    print("KERNEL_OK")
</pallas_src>

<mosaic_0001>
module attributes {stable_mosaic.version = 11 : i64} {
  func.func @_focal_loss_kernel(%arg0: i32, %arg1: i32, %arg2: memref<16x128xf32, #tpu.memory_space<vmem>>, %arg3: memref<16x128xf32, #tpu.memory_space<vmem>>, %arg4: memref<1x8x128xf32, #tpu.memory_space<vmem>>) attributes {dimension_semantics = [#tpu.dimension_semantics<parallel>, #tpu.dimension_semantics<arbitrary>], iteration_bounds = array<i64: 1, 1>, scalar_prefetch = 0 : i64, scratch_operands = 0 : i64, tpu.core_type = #tpu.core_type<tc>, window_params = [{transform_indices = @transform_0, window_bounds = array<i64: 16, 128>}, {transform_indices = @transform_1, window_bounds = array<i64: 16, 128>}, {transform_indices = @transform_2, window_bounds = array<i64: 1, 8, 128>}]} {
    %c0_i32 = arith.constant 0 : i32
    %0 = arith.cmpi eq, %arg1, %c0_i32 : i32
    %1 = arith.extui %0 : i1 to i32
    %c0_i32_0 = arith.constant 0 : i32
    %2 = arith.cmpi ne, %1, %c0_i32_0 : i32
    scf.if %2 {
      %cst_16 = arith.constant 0.000000e+00 : f32
      %32 = vector.broadcast %cst_16 : f32 to vector<1x8x128xf32>
      %c0_17 = arith.constant 0 : index
      %c0_18 = arith.constant 0 : index
      %c0_19 = arith.constant 0 : index
      %33 = vector.load %arg4[%c0_17, %c0_18, %c0_19] : memref<1x8x128xf32, #tpu.memory_space<vmem>>, vector<1x8x128xf32>
      tpu.vector_store %arg4[%c0_17, %c0_18, %c0_19], %32 {strides = array<i32>} : memref<1x8x128xf32, #tpu.memory_space<vmem>>, vector<1x8x128xf32>,
    } else {
    }
    %c0 = arith.constant 0 : index
    %c0_1 = arith.constant 0 : index
    %3 = vector.load %arg2[%c0, %c0_1] : memref<16x128xf32, #tpu.memory_space<vmem>>, vector<16x128xf32>
    %c0_2 = arith.constant 0 : index
    %c0_3 = arith.constant 0 : index
    %4 = vector.load %arg3[%c0_2, %c0_3] : memref<16x128xf32, #tpu.memory_space<vmem>>, vector<16x128xf32>
    %cst = arith.constant 0.000000e+00 : f32
    %5 = vector.broadcast %cst : f32 to vector<16x128xf32>
    %6 = arith.maximumf %3, %5 : vector<16x128xf32>
    %7 = arith.mulf %3, %4 : vector<16x128xf32>
    %8 = arith.subf %6, %7 : vector<16x128xf32>
    %9 = math.absf %3 : vector<16x128xf32>
    %cst_4 = arith.constant 0.000000e+00 : f32
    %10 = vector.broadcast %cst_4 : f32 to vector<16x128xf32>
    %11 = arith.subf %10, %9 : vector<16x128xf32>
    %12 = math.exp %11 : vector<16x128xf32>
    %13 = math.log1p %12 : vector<16x128xf32>
    %14 = arith.addf %8, %13 : vector<16x128xf32>
    %cst_5 = arith.constant 0.000000e+00 : f32
    %15 = vector.broadcast %cst_5 : f32 to vector<16x128xf32>
    %16 = arith.subf %15, %14 : vector<16x128xf32>
    %17 = math.exp %16 : vector<16x128xf32>
    %cst_6 = arith.constant 1.000000e+00 : f32
    %18 = vector.broadcast %cst_6 : f32 to vector<16x128xf32>
    %19 = arith.subf %18, %17 : vector<16x128xf32>
    %cst_7 = arith.constant 1.000000e+00 : f32
    %20 = vector.broadcast %cst_7 : f32 to vector<16x128xf32>
    %21 = arith.mulf %20, %19 : vector<16x128xf32>
    %22 = arith.mulf %21, %19 : vector<16x128xf32>
    %cst_8 = arith.constant 1.000000e+00 : f32
    %23 = vector.broadcast %cst_8 : f32 to vector<16x128xf32>
    %24 = arith.mulf %23, %22 : vector<16x128xf32>
    %25 = arith.mulf %24, %14 : vector<16x128xf32>
    %26 = vector.shape_cast %25 : vector<16x128xf32> to vector<2x8x128xf32>
    %cst_9 = arith.constant dense<0.000000e+00> : vector<8x128xf32>
    %27 = vector.multi_reduction <add>, %26, %cst_9 [0] : vector<2x8x128xf32> to vector<8x128xf32>
    %c0_10 = arith.constant 0 : index
    %c0_11 = arith.constant 0 : index
    %c0_12 = arith.constant 0 : index
    %28 = vector.load %arg4[%c0_10, %c0_11, %c0_12] : memref<1x8x128xf32, #tpu.memory_space<vmem>>, vector<1x8x128xf32>
    %29 = vector.shape_cast %27 : vector<8x128xf32> to vector<1x8x128xf32>
    %30 = arith.addf %28, %29 : vector<1x8x128xf32>
    %c0_13 = arith.constant 0 : index
    %c0_14 = arith.constant 0 : index
    %c0_15 = arith.constant 0 : index
    %31 = vector.load %arg4[%c0_13, %c0_14, %c0_15] : memref<1x8x128xf32, #tpu.memory_space<vmem>>, vector<1x8x128xf32>
    tpu.vector_store %arg4[%c0_13, %c0_14, %c0_15], %30 {strides = array<i32>} : memref<1x8x128xf32, #tpu.memory_space<vmem>>, vector<1x8x128xf32>,
    return
  }
  func.func @transform_0(%arg0: i32, %arg1: i32) -> (i32, i32) {
    %c1_i32 = arith.constant 1 : i32
    %0 = arith.muli %arg0, %c1_i32 : i32
    %1 = arith.addi %0, %arg1 : i32
    %c0_i32 = arith.constant 0 : i32
    %c0_i32_0 = arith.constant 0 : i32
    return %1, %c0_i32 : i32, i32
  }
  func.func @transform_1(%arg0: i32, %arg1: i32) -> (i32, i32) {
    %c1_i32 = arith.constant 1 : i32
    %0 = arith.muli %arg0, %c1_i32 : i32
    %1 = arith.addi %0, %arg1 : i32
    %c0_i32 = arith.constant 0 : i32
    %c0_i32_0 = arith.constant 0 : i32
    return %1, %c0_i32 : i32, i32
  }
  func.func @transform_2(%arg0: i32, %arg1: i32) -> (i32, i32, i32) {
    %c0_i32 = arith.constant 0 : i32
    %c0_i32_0 = arith.constant 0 : i32
    %c0_i32_1 = arith.constant 0 : i32
    return %arg0, %c0_i32, %c0_i32_0 : i32, i32, i32
  }
}

</mosaic_0001>

<bundles_post_ra>
// kernel: tpu_custom_call.1
= control target key start
LH: loop header
LB: loop body
LE: loop exit
PB: predicated region body
PF: predicated region fallthrough
CT: control target
= control target key end

     0   :  { %7 = vsyncpa [#allocation3], 0  ;;  %s240_s0 = inlined_call_operand.hbm [shape: f32[16,128], index: 0, kind: input, shape index: {}]   ;;  %s241_s1 = inlined_call_operand.hbm [shape: f32[16,128], index: 1, kind: input, shape index: {}]   ;;  %s242_s2 = inlined_call_operand.hbm [shape: f32[1,8,128], index: 2, kind: output, shape index: {}]  }
   0x1   :  { %8 = vsyncpa [#allocation6], 0 }
   0x2   :  { %9 = vsyncpa [#allocation4], 0  ;;  %s211_s9 = smov [#allocation2]  }
   0x3   :  { %s19_s10 = sshll.u32 %s211_s9, 4  ;;  %s20_s10 = int_to_ptr.vmem [resolvable:$true] %s19_s10 }
   0x4   :  { %s153_s11 = scalar_lea.vmem %s20_s10, 256  ;;  %p158_p1 = scmp.lt.s32.totalorder %s20_s10, %s20_s10 }
   0x5   :  { %p154_p0 = scmp.ne.s32.totalorder %s20_s10, %s153_s11  ;;  %p159_p2 = scmp.lt.s32.totalorder %s153_s11, %s153_s11 }
   0x7   :  { %p160_p3 = por %p159_p2, %p158_p1 }
   0x9   :  { %p161_p4 = pnand %p160_p3, %p154_p0 }
   0xb   :  { %164 = shalt.err (!%p161_p4)
}
   0xc   :  { %s212_s12 = smov 128   ;;  %s213_s13 = smov 8  }
   0xd   :  { %25 = dma.hbm_to_vmem [thread:$0]  %s240_s0, 256, %s20_s10, [#allocation3], %s212_s12, %s212_s12, %s213_s13  }
   0xe   :  { %s214_s16 = smov [#allocation5]  }
   0xf   :  { %s35_s17 = sshll.u32 %s214_s16, 4  ;;  %s36_s17 = int_to_ptr.vmem [resolvable:$true] %s35_s17 }
  0x10   :  { %s173_s18 = scalar_lea.vmem %s36_s17, 256  ;;  %p178_p6 = scmp.lt.s32.totalorder %s36_s17, %s36_s17 }
  0x11   :  { %p174_p5 = scmp.ne.s32.totalorder %s36_s17, %s173_s18  ;;  %p179_p7 = scmp.lt.s32.totalorder %s173_s18, %s173_s18 }
  0x13   :  { %p180_p8 = por %p179_p7, %p178_p6 }
  0x15   :  { %p181_p9 = pnand %p180_p8, %p174_p5 }
  0x17   :  { %184 = shalt.err (!%p181_p9)
}
  0x18   :  { %41 = dma.hbm_to_vmem [thread:$0]  %s241_s1, 256, %s36_s17, [#allocation6], %s212_s12, %s212_s12, %s213_s13  }
  0x19   :  { %205 = dma.done.wait [#allocation3], 256  }
  0x1a   :  { %206 = vsyncadd [#allocation3], 4294967040 }
  0x1b   :  { %207 = dma.done.wait [#allocation6], 256  }
  0x1c   :  { %208 = vsyncadd [#allocation6], 4294967040  ;;  %v57_v0 = vld [vmem:[#allocation2] sm:$0xff]  ;;  %v58_v1 = vld [vmem:[#allocation2 + $0x8] sm:$0xff]  ;;  %s215_s0 = smov [#allocation7]  }
  0x1d   :  { %v67_v2 = vand.u32 2147483647, %v57_v0  ;;  %v68_v3 = vand.u32 2147483647, %v58_v1  ;;  %v59_v14 = vld [vmem:[#allocation5] sm:$0xff]  ;;  %v60_v15 = vld [vmem:[#allocation5 + $0x8] sm:$0xff] }
  0x1e   :  { %v61_v17 = vmax.f32 %v57_v0, 0.0  ;;  %v63_v18 = vmul.f32 %v59_v14, %v57_v0  ;;  %v62_v21 = vmax.f32 %v58_v1, 0.0  ;;  %v64_v22 = vmul.f32 %v60_v15, %v58_v1  ;;  %s117_s1 = sshll.u32 %s215_s0, 4  ;;  %s118_s1 = int_to_ptr.vmem [resolvable:$true] %s117_s1 }
  0x1f   :  { %v69_v4 = vsub.f32 0.0, %v67_v2  ;;  %v70_v5 = vsub.f32 0.0, %v68_v3  ;;  %s185_s21 = scalar_lea.vmem %s118_s1, 128  ;;  %p190_p11 = scmp.lt.s32.totalorder %s118_s1, %s118_s1 }
  0x20   :  { %v65_v26 = vsub.f32 %v61_v17, %v63_v18  ;;  %v66_v29 = vsub.f32 %v62_v21, %v64_v22  ;;  %p186_p10 = scmp.ne.s32.totalorder %s118_s1, %s185_s21  ;;  %p191_p12 = scmp.lt.s32.totalorder %s185_s21, %s185_s21 }
  0x21   :  { %v71_v6 = vmul.f32 1.442695, %v69_v4  ;;  %v73_v7 = vmul.f32 1.442695, %v70_v5 }
  0x22   :  { %p192_p13 = por %p191_p12, %p190_p11 }
  0x23   :  { %133 = vpow2.f32 %v71_v6 }
  0x24   :  { %135 = vpow2.f32 %v73_v7  ;;  %p193_p0 = pnand %p192_p13, %p186_p10 }
  0x30   :  { %v134_v8 = vpop.eup %133 }
  0x31   :  { %v136_v9 = vpop.eup %135  ;;  %v75_v10 = vadd.f32 1.0, %v134_v8  ;;  %v78_v12 = vmul.f32 -0.5, %v134_v8  ;;  %v81_v19 = vand.u32 2147483647, %v134_v8 }
  0x32   :  { %v84_v11 = vadd.f32 1.0, %v136_v9  ;;  %v87_v13 = vmul.f32 -0.5, %v136_v9  ;;  %v90_v23 = vand.u32 2147483647, %v136_v9 }
  0x33   :  { %137 = vlog2.f32 %v75_v10  ;;  %v79_v16 = vadd.f32 1.0, %v78_v12  ;;  %vm82_vm0 = vcmp.lt.f32.partialorder %v81_v19, 0.0004427343 }
  0x34   :  { %139 = vlog2.f32 %v84_v11  ;;  %v88_v20 = vadd.f32 1.0, %v87_v13  ;;  %vm91_vm1 = vcmp.lt.f32.partialorder %v90_v23, 0.0004427343 }
  0x35   :  { %v80_v24 = vmul.f32 %v134_v8, %v79_v16 }
  0x36   :  { %v89_v27 = vmul.f32 %v136_v9, %v88_v20 }
  0x40   :  { %v138_v25 = vpop.eup %137 }
  0x41   :  { %v140_v28 = vpop.eup %139  ;;  %v77_v30 = vmul.f32 0.6931472, %v138_v25 }
  0x42   :  { %v86_v31 = vmul.f32 0.6931472, %v140_v28 }
  0x43   :  { %v83_v32 = vsel %vm82_vm0, %v80_v24, %v77_v30 }
  0x44   :  { %v92_v33 = vsel %vm91_vm1, %v89_v27, %v86_v31  ;;  %v93_v34 = vadd.f32 %v83_v32, %v65_v26 }
  0x45   :  { %v94_v35 = vadd.f32 %v92_v33, %v66_v29 }
  0x46   :  { %v95_v36 = vsub.f32 0.0, %v93_v34 }
  0x47   :  { %v96_v37 = vsub.f32 0.0, %v94_v35 }
  0x48   :  { %v97_v38 = vmul.f32 1.442695, %v95_v36 }
  0x49   :  { %v99_v39 = vmul.f32 1.442695, %v96_v37 }
  0x4a   :  { %141 = vpow2.f32 %v97_v38 }
  0x4b   :  { %143 = vpow2.f32 %v99_v39 }
  0x57   :  { %v142_v40 = vpop.eup %141 }
  0x58   :  { %v144_v41 = vpop.eup %143  ;;  %v101_v42 = vsub.f32 1.0, %v142_v40 }
  0x59   :  { %v102_v43 = vsub.f32 1.0, %v144_v41 }
  0x5a   :  { %v103_v44 = vmul.f32 %v101_v42, %v101_v42 }
  0x5b   :  { %v104_v45 = vmul.f32 %v102_v43, %v102_v43 }
  0x5c   :  { %v105_v46 = vmul.f32 %v103_v44, %v93_v34 }
  0x5d   :  { %v106_v47 = vmul.f32 %v104_v45, %v94_v35 }
  0x5f   :  { %v107_v48 = vadd.f32 %v106_v47, %v105_v46 }
  0x61   :  { %110 = vst [vmem:[#allocation7] sm:$0xff] %v107_v48 }
  0x62   :  { %196 = shalt.err (!%p193_p0)
}
  0x63   :  { %120 = dma.vmem_to_hbm [thread:$0]  %s118_s1, 128, %s242_s2, [#allocation4]  }
  0x64   :  { %209 = dma.done.wait [#allocation4], 128  }
  0x65   :  { %210 = vsyncadd [#allocation4], 4294967168 }
  0x66   :  { %124 = vsyncpa [#allocation3], 1 }
  0x67   :  { %125 = vsyncpa [#allocation6], 1 }
  0x68   :  { %126 = vsyncpa [#allocation4], 1 }

</bundles_post_ra>
